<compile_context>
chip_gen: v5e
topology: v5e:2x2
jax: 0.10.0
libtpu: 0.0.40
codegen_flags: <defaults>
</compile_context>

<pallas_src>
import jax
import jax.numpy as jnp
from jax.experimental import pallas as pl
from jax.experimental.pallas import tpu as pltpu


# ------------------------------ Pallas kernel --------------------------------

def _fused_block_kernel(x_ref, a1_ref, b1_ref, a2_ref, b2_ref, o_ref):
    """conv1+bn1+relu -> conv2+bn2+identity-shortcut+relu for one image.

    x_ref  : (H, W*Cin)        lane-packed input image
    a?_ref : (3*W*Cin, W*Cout) block-banded conv weights with BN scale folded in
    b?_ref : (1, W*Cout)       folded BN bias, tiled over W
    o_ref  : (H, W*Cout)
    """
    x = x_ref[...]
    H = x.shape[0]

    # (H,H) row-shift matrices: s_up @ v == v shifted down one row (zero top row),
    # s_dn @ v == v shifted up one row (zero bottom row).  Built on the VPU, applied on
    # the MXU, so the dy taps need no unaligned sublane slicing / relayouts.
    row = jax.lax.broadcasted_iota(jnp.int32, (H, H), 0)
    col = jax.lax.broadcasted_iota(jnp.int32, (H, H), 1)
    s_up = (row == col + 1).astype(jnp.float32)      # up[h]   = v[h-1]  (dy = 0 tap)
    s_dn = (row + 1 == col).astype(jnp.float32)      # down[h] = v[h+1]  (dy = 2 tap)

    def conv3x3(v, a_ref):
        up = jnp.dot(s_up, v, preferred_element_type=jnp.float32)
        dn = jnp.dot(s_dn, v, preferred_element_type=jnp.float32)
        taps = jnp.concatenate([up, v, dn], axis=1)          # (H, 3*W*C)  lane concat
        return jnp.dot(taps, a_ref[...], preferred_element_type=jnp.float32)

    h1 = jnp.maximum(conv3x3(x, a1_ref) + b1_ref[...], 0.0)  # conv1 + bn1 + relu
    h2 = conv3x3(h1, a2_ref) + b2_ref[...] + x               # conv2 + bn2 + identity shortcut
    o_ref[...] = jnp.maximum(h2, 0.0)                        # final relu


# ----------------------------- wrapper helpers --------------------------------

def _bn_fold(gamma, beta, mean, var, eps=1e-5):
    scale = gamma.astype(jnp.float32) / jnp.sqrt(var.astype(jnp.float32) + eps)
    bias = beta.astype(jnp.float32) - mean.astype(jnp.float32) * scale
    return scale, bias


def _banded_conv_weights(w_hwio, scale, W):
    """Fold a per-output-channel BN scale into a 3x3 HWIO kernel and lay it out as a
    block-banded (3*W*Cin, W*Cout) matrix: a lane-packed [x[h-1]; x[h]; x[h+1]] row-tap
    stack times this matrix equals the 'SAME'-padded 3x3 conv (W zero-padding included)."""
    w = w_hwio.astype(jnp.float32) * scale.astype(jnp.float32)[None, None, None, :]
    Cin, Cout = w.shape[2], w.shape[3]
    wp = jnp.arange(W)[:, None]                 # source column  w'
    wo = jnp.arange(W)[None, :]                 # output column  w
    dx = wp - wo + 1                            # (W, W) tap index
    valid = ((dx >= 0) & (dx <= 2)).astype(jnp.float32)
    blocks = w[:, jnp.clip(dx, 0, 2)] * valid[None, :, :, None, None]   # (3, W, W, Cin, Cout)
    # (dy, w', Cin, w, Cout) -> (3*W*Cin, W*Cout)
    return jnp.transpose(blocks, (0, 1, 3, 2, 4)).reshape(3 * W * Cin, W * Cout)


def basic_block_mvm(x_nchw, params, stride=1, option='A', eps=1e-5):
    if stride != 1:
        raise NotImplementedError("TODO(synk): stride>1 conv / option-A downsample shortcut")
    N, Cin, H, W = x_nchw.shape
    planes = params['w1'].shape[-1]
    if Cin != planes:
        raise NotImplementedError("TODO(synk): channel-padding (option A) / projection (option B) shortcut")

    # NCHW -> lane-packed channels-last: (N, H, W*Cin).
    x = jnp.transpose(x_nchw, (0, 2, 3, 1)).astype(jnp.float32).reshape(N, H, W * Cin)

    s1, b1 = _bn_fold(params['g1'], params['be1'], params['m1'], params['v1'], eps)
    s2, b2 = _bn_fold(params['g2'], params['be2'], params['m2'], params['v2'], eps)
    a1 = _banded_conv_weights(params['w1'], s1, W)            # (3*W*Cin,    W*planes)
    a2 = _banded_conv_weights(params['w2'], s2, W)            # (3*W*planes, W*planes)
    b1r = jnp.tile(b1, W).reshape(1, W * planes)
    b2r = jnp.tile(b2, W).reshape(1, W * planes)

    out = pl.pallas_call(
        _fused_block_kernel,
        out_shape=jax.ShapeDtypeStruct((N, H, W * planes), jnp.float32),
        grid=(N,),
        in_specs=[
            pl.BlockSpec((None, H, W * Cin), lambda n: (n, 0, 0)),
            pl.BlockSpec((3 * W * Cin, W * planes), lambda n: (0, 0)),
            pl.BlockSpec((1, W * planes), lambda n: (0, 0)),
            pl.BlockSpec((3 * W * planes, W * planes), lambda n: (0, 0)),
            pl.BlockSpec((1, W * planes), lambda n: (0, 0)),
        ],
        out_specs=pl.BlockSpec((None, H, W * planes), lambda n: (n, 0, 0)),
        compiler_params=pltpu.CompilerParams(
            dimension_semantics=("parallel",),
            vmem_limit_bytes=32 * 1024 * 1024,
        ),
    )(x, a1, b1r, a2, b2r)

    return jnp.transpose(out.reshape(N, H, W, planes), (0, 3, 1, 2))   # back to NCHW


# --------------------------- pure-JAX reference -------------------------------

def _ref_forward(x_nchw, params, eps=1e-5):
    x = jnp.transpose(x_nchw, (0, 2, 3, 1)).astype(jnp.float32)
    dn = ('NHWC', 'HWIO', 'NHWC')
    conv = lambda t, w: jax.lax.conv_general_dilated(
        t, w.astype(jnp.float32), (1, 1), 'SAME', dimension_numbers=dn,
        precision=jax.lax.Precision.HIGHEST)

    def bn(t, g, b, m, v):
        s = g / jnp.sqrt(v + eps)
        return t * s.reshape(1, 1, 1, -1) + (b - m * s).reshape(1, 1, 1, -1)

    out = jnp.maximum(bn(conv(x, params['w1']), params['g1'], params['be1'],
                         params['m1'], params['v1']), 0.0)
    out2 = bn(conv(out, params['w2']), params['g2'], params['be2'],
              params['m2'], params['v2'])
    out2 = jnp.maximum(out2 + x, 0.0)                     # identity shortcut + relu
    return jnp.transpose(out2, (0, 3, 1, 2))


if __name__ == "__main__":
    key = jax.random.PRNGKey(0)
    N, C, H, W = 2, 8, 16, 16          # batch=2, in_planes=planes=8, spatial=16 (W*C = 128)
    planes = 8

    ks = jax.random.split(key, 11)
    x = jax.random.normal(ks[0], (N, C, H, W), jnp.float32)

    params = dict(
        w1=0.2 * jax.random.normal(ks[1], (3, 3, C, planes), jnp.float32),
        w2=0.2 * jax.random.normal(ks[2], (3, 3, planes, planes), jnp.float32),
        g1=1.0 + 0.1 * jax.random.normal(ks[3], (planes,), jnp.float32),
        be1=0.1 * jax.random.normal(ks[4], (planes,), jnp.float32),
        m1=0.1 * jax.random.normal(ks[5], (planes,), jnp.float32),
        v1=1.0 + 0.1 * jnp.abs(jax.random.normal(ks[6], (planes,), jnp.float32)),
        g2=1.0 + 0.1 * jax.random.normal(ks[7], (planes,), jnp.float32),
        be2=0.1 * jax.random.normal(ks[8], (planes,), jnp.float32),
        m2=0.1 * jax.random.normal(ks[9], (planes,), jnp.float32),
        v2=1.0 + 0.1 * jnp.abs(jax.random.normal(ks[10], (planes,), jnp.float32)),
    )

    out = basic_block_mvm(x, params, stride=1)
    out = jax.block_until_ready(out)

    ref = _ref_forward(x, params)
    assert out.shape == (N, planes, H, W), out.shape
    max_err = float(jnp.max(jnp.abs(out - ref)))
    assert max_err < 2e-3, f"mismatch vs reference: {max_err}"

    print("KERNEL_OK")
</pallas_src>

<mosaic_0001>
module attributes {stable_mosaic.version = 11 : i64} {
  func.func @_fused_block_kernel(%arg0: i32, %arg1: memref<1x16x128xf32, #tpu.memory_space<vmem>>, %arg2: memref<384x128xf32, #tpu.memory_space<vmem>>, %arg3: memref<1x128xf32, #tpu.memory_space<vmem>>, %arg4: memref<384x128xf32, #tpu.memory_space<vmem>>, %arg5: memref<1x128xf32, #tpu.memory_space<vmem>>, %arg6: memref<1x16x128xf32, #tpu.memory_space<vmem>>) attributes {dimension_semantics = [#tpu.dimension_semantics<parallel>], iteration_bounds = array<i64: 2>, scalar_prefetch = 0 : i64, scratch_operands = 0 : i64, tpu.core_type = #tpu.core_type<tc>, window_params = [{transform_indices = @transform_0, window_bounds = array<i64: 1, 16, 128>}, {pipeline_mode = #tpu.pipeline_mode<synchronous>, transform_indices = @transform_1, window_bounds = array<i64: 384, 128>}, {pipeline_mode = #tpu.pipeline_mode<synchronous>, transform_indices = @transform_2, window_bounds = array<i64: 1, 128>}, {pipeline_mode = #tpu.pipeline_mode<synchronous>, transform_indices = @transform_3, window_bounds = array<i64: 384, 128>}, {pipeline_mode = #tpu.pipeline_mode<synchronous>, transform_indices = @transform_4, window_bounds = array<i64: 1, 128>}, {transform_indices = @transform_5, window_bounds = array<i64: 1, 16, 128>}]} {
    %c0 = arith.constant 0 : index
    %c0_0 = arith.constant 0 : index
    %c0_1 = arith.constant 0 : index
    %0 = vector.load %arg1[%c0, %c0_0, %c0_1] : memref<1x16x128xf32, #tpu.memory_space<vmem>>, vector<1x16x128xf32>
    %1 = vector.shape_cast %0 : vector<1x16x128xf32> to vector<16x128xf32>
    %2 = tpu.iota {dimensions = array<i32: 0>} : vector<16x16xi32>
    %3 = tpu.iota {dimensions = array<i32: 1>} : vector<16x16xi32>
    %c1_i32 = arith.constant 1 : i32
    %4 = vector.broadcast %c1_i32 : i32 to vector<16x16xi32>
    %5 = arith.addi %3, %4 : vector<16x16xi32>
    %6 = arith.cmpi eq, %2, %5 : vector<16x16xi32>
    %7 = arith.extui %6 : vector<16x16xi1> to vector<16x16xi32>
    %8 = arith.sitofp %7 : vector<16x16xi32> to vector<16x16xf32>
    %c1_i32_2 = arith.constant 1 : i32
    %9 = vector.broadcast %c1_i32_2 : i32 to vector<16x16xi32>
    %10 = arith.addi %2, %9 : vector<16x16xi32>
    %11 = arith.cmpi eq, %10, %3 : vector<16x16xi32>
    %12 = arith.extui %11 : vector<16x16xi1> to vector<16x16xi32>
    %13 = arith.sitofp %12 : vector<16x16xi32> to vector<16x16xf32>
    %cst = arith.constant dense<0.000000e+00> : vector<16x128xf32>
    %14 = tpu.matmul %8, %1, %cst {dimension_numbers = #tpu.dot_dimension_numbers<[1], [0], [0], [1], [0, 0, 1, 1], [], []>} : vector<16x16xf32>, vector<16x128xf32>, vector<16x128xf32> -> vector<16x128xf32>
    %cst_3 = arith.constant dense<0.000000e+00> : vector<16x128xf32>
    %15 = tpu.matmul %13, %1, %cst_3 {dimension_numbers = #tpu.dot_dimension_numbers<[1], [0], [0], [1], [0, 0, 1, 1], [], []>} : vector<16x16xf32>, vector<16x128xf32>, vector<16x128xf32> -> vector<16x128xf32>
    %16 = tpu.concatenate %14, %1, %15 in 1 : vector<16x128xf32>, vector<16x128xf32>, vector<16x128xf32> -> vector<16x384xf32>
    %c0_4 = arith.constant 0 : index
    %c0_5 = arith.constant 0 : index
    %17 = vector.load %arg2[%c0_4, %c0_5] : memref<384x128xf32, #tpu.memory_space<vmem>>, vector<384x128xf32>
    %cst_6 = arith.constant dense<0.000000e+00> : vector<16x128xf32>
    %18 = tpu.matmul %16, %17, %cst_6 {dimension_numbers = #tpu.dot_dimension_numbers<[1], [0], [0], [1], [0, 0, 1, 1], [], []>} : vector<16x384xf32>, vector<384x128xf32>, vector<16x128xf32> -> vector<16x128xf32>
    %c0_7 = arith.constant 0 : index
    %c0_8 = arith.constant 0 : index
    %19 = vector.load %arg3[%c0_7, %c0_8] : memref<1x128xf32, #tpu.memory_space<vmem>>, vector<1x128xf32>
    %20 = vector.broadcast %19 : vector<1x128xf32> to vector<16x128xf32>
    %21 = arith.addf %18, %20 : vector<16x128xf32>
    %cst_9 = arith.constant 0.000000e+00 : f32
    %22 = vector.broadcast %cst_9 : f32 to vector<16x128xf32>
    %23 = arith.maximumf %21, %22 : vector<16x128xf32>
    %cst_10 = arith.constant dense<0.000000e+00> : vector<16x128xf32>
    %24 = tpu.matmul %8, %23, %cst_10 {dimension_numbers = #tpu.dot_dimension_numbers<[1], [0], [0], [1], [0, 0, 1, 1], [], []>} : vector<16x16xf32>, vector<16x128xf32>, vector<16x128xf32> -> vector<16x128xf32>
    %cst_11 = arith.constant dense<0.000000e+00> : vector<16x128xf32>
    %25 = tpu.matmul %13, %23, %cst_11 {dimension_numbers = #tpu.dot_dimension_numbers<[1], [0], [0], [1], [0, 0, 1, 1], [], []>} : vector<16x16xf32>, vector<16x128xf32>, vector<16x128xf32> -> vector<16x128xf32>
    %26 = tpu.concatenate %24, %23, %25 in 1 : vector<16x128xf32>, vector<16x128xf32>, vector<16x128xf32> -> vector<16x384xf32>
    %c0_12 = arith.constant 0 : index
    %c0_13 = arith.constant 0 : index
    %27 = vector.load %arg4[%c0_12, %c0_13] : memref<384x128xf32, #tpu.memory_space<vmem>>, vector<384x128xf32>
    %cst_14 = arith.constant dense<0.000000e+00> : vector<16x128xf32>
    %28 = tpu.matmul %26, %27, %cst_14 {dimension_numbers = #tpu.dot_dimension_numbers<[1], [0], [0], [1], [0, 0, 1, 1], [], []>} : vector<16x384xf32>, vector<384x128xf32>, vector<16x128xf32> -> vector<16x128xf32>
    %c0_15 = arith.constant 0 : index
    %c0_16 = arith.constant 0 : index
    %29 = vector.load %arg5[%c0_15, %c0_16] : memref<1x128xf32, #tpu.memory_space<vmem>>, vector<1x128xf32>
    %30 = vector.broadcast %29 : vector<1x128xf32> to vector<16x128xf32>
    %31 = arith.addf %28, %30 : vector<16x128xf32>
    %32 = arith.addf %31, %1 : vector<16x128xf32>
    %cst_17 = arith.constant 0.000000e+00 : f32
    %33 = vector.broadcast %cst_17 : f32 to vector<16x128xf32>
    %34 = arith.maximumf %32, %33 : vector<16x128xf32>
    %c0_18 = arith.constant 0 : index
    %c0_19 = arith.constant 0 : index
    %c0_20 = arith.constant 0 : index
    %35 = vector.load %arg6[%c0_18, %c0_19, %c0_20] : memref<1x16x128xf32, #tpu.memory_space<vmem>>, vector<1x16x128xf32>
    %36 = vector.shape_cast %35 : vector<1x16x128xf32> to vector<16x128xf32>
    %37 = vector.shape_cast %34 : vector<16x128xf32> to vector<1x16x128xf32>
    tpu.vector_store %arg6[%c0_18, %c0_19, %c0_20], %37 {strides = array<i32>} : memref<1x16x128xf32, #tpu.memory_space<vmem>>, vector<1x16x128xf32>,
    return
  }
  func.func @transform_0(%arg0: i32) -> (i32, i32, i32) {
    %c0_i32 = arith.constant 0 : i32
    %c0_i32_0 = arith.constant 0 : i32
    %c0_i32_1 = arith.constant 0 : i32
    return %arg0, %c0_i32, %c0_i32_0 : i32, i32, i32
  }
  func.func @transform_1(%arg0: i32) -> (i32, i32) {
    %c0_i32 = arith.constant 0 : i32
    %c0_i32_0 = arith.constant 0 : i32
    %c0_i32_1 = arith.constant 0 : i32
    return %c0_i32, %c0_i32_0 : i32, i32
  }
  func.func @transform_2(%arg0: i32) -> (i32, i32) {
    %c0_i32 = arith.constant 0 : i32
    %c0_i32_0 = arith.constant 0 : i32
    %c0_i32_1 = arith.constant 0 : i32
    return %c0_i32, %c0_i32_0 : i32, i32
  }
  func.func @transform_3(%arg0: i32) -> (i32, i32) {
    %c0_i32 = arith.constant 0 : i32
    %c0_i32_0 = arith.constant 0 : i32
    %c0_i32_1 = arith.constant 0 : i32
    return %c0_i32, %c0_i32_0 : i32, i32
  }
  func.func @transform_4(%arg0: i32) -> (i32, i32) {
    %c0_i32 = arith.constant 0 : i32
    %c0_i32_0 = arith.constant 0 : i32
    %c0_i32_1 = arith.constant 0 : i32
    return %c0_i32, %c0_i32_0 : i32, i32
  }
  func.func @transform_5(%arg0: i32) -> (i32, i32, i32) {
    %c0_i32 = arith.constant 0 : i32
    %c0_i32_0 = arith.constant 0 : i32
    %c0_i32_1 = arith.constant 0 : i32
    return %arg0, %c0_i32, %c0_i32_0 : i32, i32, i32
  }
}

</mosaic_0001>

<bundles_post_ra>
// kernel: tpu_custom_call.1
= control target key start
LH: loop header
LB: loop body
LE: loop exit
PB: predicated region body
PF: predicated region fallthrough
CT: control target
= control target key end

     0   :  { %10 = vsyncpa [#allocation3], 0  ;;  %s1280_s0 = inlined_call_operand.hbm [shape: f32[2,16,128], index: 0, kind: input, shape index: {}]   ;;  %s1281_s1 = inlined_call_operand.hbm [shape: f32[384,128], index: 1, kind: input, shape index: {}]   ;;  %s1282_s2 = inlined_call_operand.vmem [shape: f32[1,128], index: 2, kind: input, shape index: {}]   ;;  %s1283_s3 = inlined_call_operand.hbm [shape: f32[384,128], index: 3, kind: input, shape index: {}]   ;;  %s1284_s4 = inlined_call_operand.vmem [shape: f32[1,128], index: 4, kind: input, shape index: {}]   ;;  %s1285_s5 = inlined_call_operand.hbm [shape: f32[2,16,128], index: 5, kind: output, shape index: {}]  }
   0x1   :  { %12 = vsyncpa [#allocation3 + $0x1], 0 }
   0x2   :  { %13 = vsyncpa [#allocation6], 0 }
   0x3   :  { %14 = vsyncpa [#allocation4], 0 }
   0x4   :  { %16 = vsyncpa [#allocation4 + $0x1], 0  ;;  %s1084_s18 = smov 0   ;;  %s1086_s19 = smov 0  }
   0x5   :  { %s1088_s20 = smov 0   ;;  %s1090_s21 = smov 0  }
   0x6 LB: > { %s1105_s22 = sadd.s32 4294967295, %s1045_s21   ;;  %s763_s23 = sadd.s32 4294967294, %s1045_s21   ;;  %s1045_s21 = sphi %s1090_s21, %s1297_s21   ;;  %s1041_s20 = sphi %s1088_s20, %s1296_s20   ;;  %s1037_s19 = sphi %s1086_s19, %s1295_s19   ;;  %s1033_s18 = sphi %s1084_s18, %s1294_s18  }
   0x7   : > { %p42_p0 = scmp.ne.s32.totalorder %s1037_s19, %s1033_s18  ;;  %p43_p1 = scmp.eq.s32.totalorder %s1105_s22, 0 }
   0x8   : > { %p150_p2 = scmp.eq.s32.totalorder %s1105_s22, 1  ;;  %p156_p3 = scmp.eq.s32.totalorder %s763_s23, 1 }
   0x9   : > { %p1114_p4 = por %p43_p1, %p42_p0  ;;  %p764_p5 = scmp.ge.s32.totalorder %s1045_s21, 1 }
   0xa   : > { %p1119_p6 = por %p156_p3, %p42_p0  ;;  %p163_p7 = scmp.lt.s32.totalorder %s1045_s21, 3 }
   0xb   : > { %s174_s28 = sshll.u32 %s1281_s1, 4  ;;  %s1047_s30 = smov [#allocation5]   ;;  %s175_s28 = int_to_ptr.hbm [resolvable:$true] %s174_s28 }
   0xc   : > { %p1127_p8 = pnand %p764_p5, %p163_p7  ;;  %s176_s6 = sshll.u32 %s1047_s30, 4  ;;  %s177_s6 = int_to_ptr.vmem [resolvable:$true] %s176_s6 }
   0xd   : > { %s191_s9 = sshll.u32 %s1283_s3, 4  ;;  %s1286_s10 = smov 128   ;;  %s192_s9 = int_to_ptr.hbm [resolvable:$true] %s191_s9 }
   0xe   : > { %p823_p9 = pneg %p1127_p8  ;;  %s1049_s11 = smov 8  }
   0xf   : > { %s1050_s12 = smov [#allocation7]   ;;  %s1146_s14 = sadd.s32 1, %s1045_s21  }
  0x10   : > { %p824_p10 = pnand %p823_p9, %p43_p1  ;;  %s193_s13 = sshll.u32 %s1050_s12, 4  ;;  %s194_s13 = int_to_ptr.vmem [resolvable:$true] %s193_s13 }
  0x11   : > { %s29_s15 = sadd.s32 1, %s1041_s20  ;;  %s26_s16 = ssub.s32 %s1045_s21, %s1146_s14 }
  0x12   : > { %826 = dma.hbm_to_vmem [thread:$0]  (!%p824_p10), %s175_s28, 6144, %s177_s6, [#allocation6], %s1286_s10, %s1286_s10, %s1049_s11  }
  0x13   : > { %829 = dma.hbm_to_vmem [thread:$0]  (!%p824_p10), %s192_s9, 6144, %s194_s13, [#allocation6], %s1286_s10, %s1286_s10, %s1049_s11  }
  0x14   : > { %p36_p12 = scmp.ne.s32.totalorder %s1041_s20, %s1037_s19  ;;  %p27_p13 = scmp.eq.s32.totalorder %s26_s16, 0 }
  0x15   : > { %p37_p0 = scmp.eq.s32.totalorder %s1045_s21, 0  ;;  %p840_p5 = scmp.lt.s32.totalorder %s1045_s21, 2 }
  0x16   : > { %p1156_p3 = por %p150_p2, %p36_p12  ;;  %s210_s26 = sand.u32 1, %s1041_s20  }
  0x17   : > { %s1162_s23 = scalar_select %p27_p13, %s1041_s20, %s29_s15  }
  0x18   : > { %p38_p7 = por %p37_p0, %p36_p12  ;;  %s768_s27 = sshll.u32 %s210_s26, 4 }
  0x19   : > { %s793_s28 = sshll.u32 %s1045_s21, 4  ;;  %s214_s8 = scalar_lea.vmem [#allocation2], %s768_s27 }
  0x1a   : > { %s219_s7 = scalar_lea.hbm %s1280_s0, %s793_s28  ;;  %s222_s9 = sshll.u32 %s214_s8, 4  ;;  %s223_s9 = int_to_ptr.vmem [resolvable:$true] %s222_s9 }
  0x1b   : > { %s220_s12 = sshll.u32 %s219_s7, 4  ;;  %p1169_p2 = pnand %p840_p5, %p38_p7  ;;  %s221_s12 = int_to_ptr.hbm [resolvable:$true] %s220_s12 }
  0x1c   : > { %s211_s15 = scalar_lea.sflag [#allocation3], %s210_s26  ;;  %s945_s16 = sshra.s32 %s221_s12, 4  ;;  %s946_s16 = int_to_ptr.hbm [resolvable:$true] %s945_s16 }
  0x1d   : > { %s947_s10 = scalar_lea.hbm %s946_s16, 16  ;;  %p949_p10 = pneg %p1169_p2 }
  0x1e   : > { %p948_p9 = scmp.ne.s32.totalorder %s946_s16, %s947_s10  ;;  %s952_s30 = scalar_lea.hbm %s1280_s0, 32 }
  0x1f   : > { %p953_p0 = scmp.lt.s32.totalorder %s946_s16, %s1280_s0  ;;  %p954_p5 = scmp.lt.s32.totalorder %s952_s30, %s947_s10 }
  0x20   : > { %p950_p12 = pnand %p949_p10, %p948_p9 }
  0x21   : > { %p955_p7 = por %p954_p5, %p953_p0 }
  0x22   : > { %p951_p13 = pneg %p950_p12 }
  0x24   : > { %p956_p11 = pnand %p955_p7, %p951_p13 }
  0x26   : > { %959 = shalt.err (!%p956_p11)
}
  0x27   : > { %s1292_s26 = smov 128   ;;  %234 = sbr.rel (%p1127_p8) target bundleno = 618 (0x26a), region = 40 }
  0x28   : > { %833 = dma.hbm_to_vmem [thread:$0]  (!%p1169_p2), %s221_s12, 256, %s223_s9, %s211_s15, %s1292_s26, %s1292_s26, %s1049_s11  }
  0x29   : > { %s1189_s8 = sand.u32 (!%p1127_p8), 1, %s1037_s19  }
  0x2a   : > { %s772_s10 = sshll.u32 (!%p1127_p8), %s1189_s8, 4  ;;  %s237_s16 = scalar_lea.sflag (!%p1127_p8), [#allocation3], %s1189_s8 }
  0x2b   : > { %s240_s28 = scalar_lea.vmem (!%p1127_p8), [#allocation2], %s772_s10 }
  0x2c   : > { %1020 = dma.done.wait (%p1114_p4), %s237_s16, 256  }
  0x2d   : > { %1022 = vsyncadd (%p1114_p4), %s237_s16, 4294967040 }
  0x2e   : > { %1024 = dma.done.wait (%p43_p1), [#allocation6], 12288  }
  0x2f   : > { %1026 = vsyncadd (%p43_p1), [#allocation6], 4294955008  ;;  %v280_v0 = vlaneseq  ;;  %v1203_v5 = vld [vmem:[%s240_s28 + $0x8] sm:$0xff]  ;;  %v1205_v6 = vld [vmem:[%s240_s28] sm:$0xff]  ;;  %v1051_v9 = vmov 0.0   ;;  %vm300_vm2 = vcmask 130048  }
  0x30   : > { %v374_v8 = vld [vmem:[#allocation5 + $0x78] sm:$0xff]  ;;  %321 = vmatpush.msra.mxu0 %v1203_v5  ;;  %350 = vmatpush.msra.mxu1 %v1203_v5  ;;  %v373_v14 = vld [vmem:[#allocation5 + $0x70] sm:$0xff]  ;;  %v372_v16 = vld [vmem:[#allocation5 + $0x68] sm:$0xff]  ;;  %s794_s12 = sshll.u32 %s1105_s22, 4  ;;  %s277_s30 = scalar_lea.vmem [#allocation8], %s772_s10 }
  0x31   : > { %v281_v1 = vshrl.u32 %v280_v0, 7  ;;  %v284_v2 = vand.u32 127, %v280_v0  ;;  %v390_v12 = vld [vmem:[#allocation5 + $0xf8] sm:$0xff]  ;;  %411 = vmatpush.msra.mxu2 %v374_v8  ;;  %v389_v15 = vld [vmem:[#allocation5 + $0xf0] sm:$0xff]  ;;  %v388_v17 = vld [vmem:[#allocation5 + $0xe8] sm:$0xff]  ;;  %s667_s27 = scalar_lea.hbm %s1285_s5, %s794_s12  ;;  %s668_s6 = sshll.u32 %s277_s30, 4  ;;  %s669_s6 = int_to_ptr.vmem [resolvable:$true] %s668_s6 }
  0x32   : > { %434 = vmatpush.msra.mxu3 %v390_v12  ;;  %322 = vmatpush.msra.mxu0 %v1205_v6  ;;  %v406_v18 = vld [vmem:[#allocation5 + $0x178] sm:$0xff]  ;;  %v405_v19 = vld [vmem:[#allocation5 + $0x170] sm:$0xff]  ;;  %v371_v20 = vld [vmem:[#allocation5 + $0x60] sm:$0xff]  ;;  %s670_s7 = sshll.u32 %s667_s27, 4  ;;  %s656_s22 = scalar_lea.sflag [#allocation4], %s1189_s8  ;;  %s671_s7 = int_to_ptr.hbm [resolvable:$true] %s670_s7 }
  0x33   : > { %v285_v3 = vadd.s32 1, %v284_v2  ;;  %v292_v4 = vadd.s32 1, %v281_v1  ;;  %v282_v7 = vadd.s32 8, %v281_v1  ;;  %351 = vmatpush.msra.mxu1 %v1205_v6  ;;  %412 = vmatpush.msra.mxu2 %v373_v14  ;;  %v387_v21 = vld [vmem:[#allocation5 + $0xe0] sm:$0xff]  ;;  %v404_v22 = vld [vmem:[#allocation5 + $0x168] sm:$0xff]  ;;  %v370_v23 = vld [vmem:[#allocation5 + $0x58] sm:$0xff] }
  0x34   : > { %435 = vmatpush.msra.mxu3 %v389_v15  ;;  %457 = vmatpush.msrb.mxu0 %v406_v18  ;;  %v386_v24 = vld [vmem:[#allocation5 + $0xd8] sm:$0xff]  ;;  %v369_v27 = vld [vmem:[#allocation5 + $0x50] sm:$0xff]  ;;  %v403_v29 = vld [vmem:[#allocation5 + $0x160] sm:$0xff]  ;;  %s989_s26 = sshra.s32 %s671_s7, 4  ;;  %s995_s24 = scalar_lea.hbm %s1285_s5, 32  ;;  %s990_s26 = int_to_ptr.hbm [resolvable:$true] %s989_s26 }
  0x35   : > { %vm286_vm0 = vcmp.eq.s32.totalorder %v281_v1, %v285_v3  ;;  %vm294_vm1 = vcmp.eq.s32.totalorder %v292_v4, %v284_v2  ;;  %v293_v13 = vadd.s32 1, %v282_v7  ;;  %vm287_vm3 = vcmp.eq.s32.totalorder %v282_v7, %v285_v3  ;;  %413 = vmatpush.msra.mxu2 %v372_v16  ;;  %v385_v28 = vld [vmem:[#allocation5 + $0xd0] sm:$0xff]  ;;  %v368_v30 = vld [vmem:[#allocation5 + $0x48] sm:$0xff]  ;;  %v402_v32 = vld [vmem:[#allocation5 + $0x158] sm:$0xff]  ;;  %s991_s16 = scalar_lea.hbm %s990_s26, 16  ;;  %p996_p11 = scmp.lt.s32.totalorder %s990_s26, %s1285_s5 }
  0x36   : > { %v1208_v10 = vsel %vm286_vm0, 1.0, %v1051_v9  ;;  %v1211_v11 = vsel %vm294_vm1, 1.0, %v1051_v9  ;;  %436 = vmatpush.msra.mxu3 %v388_v17  ;;  %458 = vmatpush.msrb.mxu0 %v405_v19  ;;  %v1219_v25 = vsel %vm287_vm3, 1.0, %v1051_v9  ;;  %v384_v31 = vld [vmem:[#allocation5 + $0xc8] sm:$0xff]  ;;  %v367_v33 = vld [vmem:[#allocation5 + $0x40] sm:$0xff]  ;;  %v401_v35 = vld [vmem:[#allocation5 + $0x150] sm:$0xff]  ;;  %p992_p1 = scmp.ne.s32.totalorder %s990_s26, %s991_s16  ;;  %p997_p2 = scmp.lt.s32.totalorder %s995_s24, %s991_s16 }
  0x37   : > { %780 = vmatmul.msk.f32.vlgmr.msra.gmra.mxu0 %vm300_vm2, %v1208_v10  ;;  %782 = vmatmul.msk.f32.vlgmr.msra.gmra.mxu1 %vm300_vm2, %v1211_v11  ;;  %vm295_vm4 = vcmp.eq.s32.totalorder %v293_v13, %v284_v2  ;;  %v383_v34 = vld [vmem:[#allocation5 + $0xc0] sm:$0xff]  ;;  %v366_v36 = vld [vmem:[#allocation5 + $0x38] sm:$0xff]  ;;  %v400_v38 = vld [vmem:[#allocation5 + $0x148] sm:$0xff] }
  0x38   : > { %v1221_v26 = vsel %vm295_vm4, 1.0, %v1051_v9  ;;  %414 = vmatpush.msra.mxu2 %v371_v20  ;;  %437 = vmatpush.msra.mxu3 %v387_v21  ;;  %v382_v37 = vld [vmem:[#allocation5 + $0xb8] sm:$0xff]  ;;  %v365_v39 = vld [vmem:[#allocation5 + $0x30] sm:$0xff]  ;;  %v399_v41 = vld [vmem:[#allocation5 + $0x140] sm:$0xff]  ;;  %p993_p4 = pnand %p992_p1, %p1156_p3  ;;  %p998_p9 = por %p997_p2, %p996_p11 }
  0x39   : > { %459 = vmatpush.msrb.mxu0 %v404_v22  ;;  %v381_v40 = vld [vmem:[#allocation5 + $0xb0] sm:$0xff]  ;;  %v364_v42 = vld [vmem:[#allocation5 + $0x28] sm:$0xff]  ;;  %v398_v44 = vld [vmem:[#allocation5 + $0x138] sm:$0xff] }
  0x3a   : > { %415 = vmatpush.msra.mxu2 %v370_v23  ;;  %438 = vmatpush.msra.mxu3 %v386_v24  ;;  %v380_v43 = vld [vmem:[#allocation5 + $0xa8] sm:$0xff]  ;;  %v363_v45 = vld [vmem:[#allocation5 + $0x20] sm:$0xff]  ;;  %v397_v47 = vld [vmem:[#allocation5 + $0x130] sm:$0xff]  ;;  %p994_p8 = pneg %p993_p4 }
  0x3b   : > { %460 = vmatpush.msrb.mxu0 %v403_v29  ;;  %v379_v46 = vld [vmem:[#allocation5 + $0xa0] sm:$0xff]  ;;  %v362_v48 = vld [vmem:[#allocation5 + $0x18] sm:$0xff]  ;;  %v361_v50 = vld [vmem:[#allocation5 + $0x10] sm:$0xff] }
  0x3c   : > { %416 = vmatpush.msra.mxu2 %v369_v27  ;;  %439 = vmatpush.msra.mxu3 %v385_v28  ;;  %v378_v49 = vld [vmem:[#allocation5 + $0x98] sm:$0xff]  ;;  %v377_v51 = vld [vmem:[#allocation5 + $0x90] sm:$0xff]  ;;  %v360_v52 = vld [vmem:[#allocation5 + $0x8] sm:$0xff]  ;;  %p999_p10 = pnand %p998_p9, %p994_p8 }
  0x3d   : > { %461 = vmatpush.msrb.mxu0 %v402_v32  ;;  %v359_v53 = vld [vmem:[#allocation5] sm:$0xff]  ;;  %v376_v54 = vld [vmem:[#allocation5 + $0x88] sm:$0xff]  ;;  %v394_v58 = vld [vmem:[#allocation5 + $0x118] sm:$0xff] }
  0x3e   : > { %417 = vmatpush.msra.mxu2 %v368_v30  ;;  %440 = vmatpush.msra.mxu3 %v384_v31  ;;  %v396_v55 = vld [vmem:[#allocation5 + $0x128] sm:$0xff]  ;;  %v375_v56 = vld [vmem:[#allocation5 + $0x80] sm:$0xff]  ;;  %v393_v59 = vld [vmem:[#allocation5 + $0x110] sm:$0xff] }
  0x3f   : > { %781 = vmatmul.msk.f32.gmra.mxu0 %vm300_vm2, %v1219_v25  ;;  %783 = vmatmul.msk.f32.gmra.mxu1 %vm300_vm2, %v1221_v26  ;;  %v395_v57 = vld [vmem:[#allocation5 + $0x120] sm:$0xff]  ;;  %v392_v60 = vld [vmem:[#allocation5 + $0x108] sm:$0xff]  ;;  %v559_v62 = vld [vmem:[#allocation7 + $0xf8] sm:$0xff] }
  0x40   : > { %418 = vmatpush.msra.mxu2 %v367_v33  ;;  %441 = vmatpush.msra.mxu3 %v383_v34  ;;  %v391_v61 = vld [vmem:[#allocation5 + $0x100] sm:$0xff]  ;;  %v558_v63 = vld [vmem:[#allocation7 + $0xf0] sm:$0xff]  ;;  %v557_v0 = vld [vmem:[#allocation7 + $0xe8] sm:$0xff] }
  0x41   : > { %462 = vmatpush.msrb.mxu0 %v401_v35  ;;  %v556_v1 = vld [vmem:[#allocation7 + $0xe0] sm:$0xff]  ;;  %v555_v2 = vld [vmem:[#allocation7 + $0xd8] sm:$0xff]  ;;  %v554_v3 = vld [vmem:[#allocation7 + $0xd0] sm:$0xff] }
  0x42   : > { %419 = vmatpush.msra.mxu2 %v366_v36  ;;  %442 = vmatpush.msra.mxu3 %v382_v37  ;;  %v553_v4 = vld [vmem:[#allocation7 + $0xc8] sm:$0xff]  ;;  %v552_v7 = vld [vmem:[#allocation7 + $0xc0] sm:$0xff]  ;;  %v551_v8 = vld [vmem:[#allocation7 + $0xb8] sm:$0xff] }
  0x43   : > { %463 = vmatpush.msrb.mxu0 %v400_v38  ;;  %v550_v9 = vld [vmem:[#allocation7 + $0xb0] sm:$0xff]  ;;  %v549_v12 = vld [vmem:[#allocation7 + $0xa8] sm:$0xff]  ;;  %v548_v17 = vld [vmem:[#allocation7 + $0xa0] sm:$0xff] }
  0x44   : > { %420 = vmatpush.msra.mxu2 %v365_v39  ;;  %443 = vmatpush.msra.mxu3 %v381_v40  ;;  %v547_v18 = vld [vmem:[#allocation7 + $0x98] sm:$0xff]  ;;  %v546_v19 = vld [vmem:[#allocation7 + $0x90] sm:$0xff]  ;;  %v545_v20 = vld [vmem:[#allocation7 + $0x88] sm:$0xff] }
  0x45   : > { %464 = vmatpush.msrb.mxu0 %v399_v41  ;;  %v544_v21 = vld [vmem:[#allocation7 + $0x80] sm:$0xff]  ;;  %v543_v37 = vld [vmem:[#allocation7 + $0x78] sm:$0xff]  ;;  %v542_v38 = vld [vmem:[#allocation7 + $0x70] sm:$0xff] }
  0x46   : > { %421 = vmatpush.msra.mxu2 %v364_v42  ;;  %444 = vmatpush.msra.mxu3 %v380_v43  ;;  %v883_v22 = vld [vmem:[%s1282_s2] ss:$0 sm:$0xff]  ;;  %v541_v41 = vld [vmem:[#allocation7 + $0x68] sm:$0xff]  ;;  %v575_v42 = vld [vmem:[#allocation7 + $0x178] sm:$0xff] }
  0x47   : > { %465 = vmatpush.msrb.mxu0 %v398_v44  ;;  %v574_v43 = vld [vmem:[#allocation7 + $0x170] sm:$0xff]  ;;  %v540_v44 = vld [vmem:[#allocation7 + $0x60] sm:$0xff] }
  0x48   : > { %422 = vmatpush.msra.mxu2 %v363_v45  ;;  %445 = vmatpush.msra.mxu3 %v379_v46  ;;  %v573_v45 = vld [vmem:[#allocation7 + $0x168] sm:$0xff]  ;;  %v539_v46 = vld [vmem:[#allocation7 + $0x58] sm:$0xff] }
  0x49   : > { %466 = vmatpush.msrb.mxu0 %v397_v47  ;;  %v572_v47 = vld [vmem:[#allocation7 + $0x160] sm:$0xff] }
  0x4a   : > { %423 = vmatpush.msra.mxu2 %v362_v48  ;;  %446 = vmatpush.msra.mxu3 %v378_v49  ;;  %v538_v48 = vld [vmem:[#allocation7 + $0x50] sm:$0xff]  ;;  %v571_v49 = vld [vmem:[#allocation7 + $0x158] sm:$0xff] }
  0x4b   : > { %467 = vmatpush.msrb.mxu0 %v396_v55  ;;  %v531_v55 = vld [vmem:[#allocation7 + $0x18] sm:$0xff] }
  0x4c   : > { %424 = vmatpush.msra.mxu2 %v361_v50  ;;  %447 = vmatpush.msra.mxu3 %v377_v51  ;;  %v537_v50 = vld [vmem:[#allocation7 + $0x48] sm:$0xff]  ;;  %v536_v51 = vld [vmem:[#allocation7 + $0x40] sm:$0xff] }
  0x4d   : > { %468 = vmatpush.msrb.mxu0 %v395_v57  ;;  %v529_v57 = vld [vmem:[#allocation7 + $0x8] sm:$0xff] }
  0x4e   : > { %425 = vmatpush.msra.mxu2 %v360_v52  ;;  %448 = vmatpush.msra.mxu3 %v376_v54  ;;  %v535_v52 = vld [vmem:[#allocation7 + $0x38] sm:$0xff]  ;;  %v532_v54 = vld [vmem:[#allocation7 + $0x20] sm:$0xff] }
  0x4f   : > { %469 = vmatpush.msrb.mxu0 %v394_v58  ;;  %v569_v58 = vld [vmem:[#allocation7 + $0x148] sm:$0xff] }
  0x50   : > { %426 = vmatpush.msra.mxu2 %v359_v53  ;;  %449 = vmatpush.msra.mxu3 %v375_v56  ;;  %v533_v53 = vld [vmem:[#allocation7 + $0x28] sm:$0xff]  ;;  %v570_v56 = vld [vmem:[#allocation7 + $0x150] sm:$0xff] }
  0x51   : > { %450 = vmatmul.f32.vlgmr.msra.gmra.mxu3 %v1205_v6  ;;  %470 = vmatpush.msrb.mxu0 %v393_v59  ;;  %v528_v59 = vld [vmem:[#allocation7] sm:$0xff] }
  0x52   : > { %603 = vmatpush.msrb.mxu3 %v559_v62  ;;  %580 = vmatpush.msrb.mxu2 %v543_v37  ;;  %v565_v62 = vld [vmem:[#allocation7 + $0x128] sm:$0xff] }
  0x53   : > { %471 = vmatpush.msrb.mxu0 %v392_v60  ;;  %v568_v60 = vld [vmem:[#allocation7 + $0x140] sm:$0xff] }
  0x54   : > { %604 = vmatpush.msrb.mxu3 %v558_v63  ;;  %581 = vmatpush.msrb.mxu2 %v542_v38  ;;  %v563_v63 = vld [vmem:[#allocation7 + $0x118] sm:$0xff] }
  0x55   : > { %472 = vmatpush.msrb.mxu0 %v391_v61  ;;  %v566_v61 = vld [vmem:[#allocation7 + $0x130] sm:$0xff] }
  0x56   : > { %605 = vmatpush.msrb.mxu3 %v557_v0  ;;  %582 = vmatpush.msrb.mxu2 %v541_v41  ;;  %v562_v0 = vld [vmem:[#allocation7 + $0x110] sm:$0xff] }
  0x57   : > { %626 = vmatpush.msra.mxu0 %v575_v42 }
  0x58   : > { %606 = vmatpush.msrb.mxu3 %v556_v1  ;;  %583 = vmatpush.msrb.mxu2 %v540_v44  ;;  %v561_v1 = vld [vmem:[#allocation7 + $0x108] sm:$0xff] }
  0x59   : > { %453 = vmatmul.f32.gmra.mxu3 %v1203_v5  ;;  %627 = vmatpush.msra.mxu0 %v574_v43 }
  0x5a   : > { %607 = vmatpush.msrb.mxu3 %v555_v2  ;;  %584 = vmatpush.msrb.mxu2 %v539_v46  ;;  %v560_v2 = vld [vmem:[#allocation7 + $0x100] sm:$0xff] }
  0x5b   : > { %628 = vmatpush.msra.mxu0 %v573_v45 }
  0x5c   : > { %608 = vmatpush.msrb.mxu3 %v554_v3  ;;  %585 = vmatpush.msrb.mxu2 %v538_v48 }
  0x5d   : > { %629 = vmatpush.msra.mxu0 %v572_v47 }
  0x5e   : > { %609 = vmatpush.msrb.mxu3 %v553_v4  ;;  %586 = vmatpush.msrb.mxu2 %v537_v50 }
  0x5f   : > { %630 = vmatpush.msra.mxu0 %v571_v49 }
  0x60   : > { %610 = vmatpush.msrb.mxu3 %v552_v7  ;;  %587 = vmatpush.msrb.mxu2 %v536_v51 }
  0x61   : > { %631 = vmatpush.msra.mxu0 %v570_v56 }
  0x62   : > { %611 = vmatpush.msrb.mxu3 %v551_v8  ;;  %588 = vmatpush.msrb.mxu2 %v535_v52 }
  0x63   : > { %632 = vmatpush.msra.mxu0 %v569_v58 }
  0x64   : > { %612 = vmatpush.msrb.mxu3 %v550_v9 }
  0x65   : > { %633 = vmatpush.msra.mxu0 %v568_v60 }
  0x66   : > { %613 = vmatpush.msrb.mxu3 %v549_v12  ;;  %v884_v12 = vld [vmem:[%s1284_s4] ss:$0 sm:$0xff] }
  0x68   : > { %614 = vmatpush.msrb.mxu3 %v548_v17 }
  0x6a   : > { %615 = vmatpush.msrb.mxu3 %v547_v18 }
  0x6c   : > { %616 = vmatpush.msrb.mxu3 %v546_v19 }
  0x6e   : > { %617 = vmatpush.msrb.mxu3 %v545_v20 }
  0x70   : > { %618 = vmatpush.msrb.mxu3 %v544_v21 }
  0xb4   : > { %v324_v13 = vpop.f32.mrf.mxu0  ;;  %v353_v14 = vpop.f32.mrf.mxu1 }
  0xb5   : > { %427 = vmatmul.f32.vlgmr.msra.gmra.mxu2 %v324_v13  ;;  %473 = vmatmul.f32.vlgmr.msrb.gmra.mxu0 %v353_v14 }
  0xbc   : > { %v327_v15 = vpop.f32.mrf.mxu0  ;;  %v356_v16 = vpop.f32.mrf.mxu1 }
  0xbd   : > { %430 = vmatmul.f32.gmra.mxu2 %v327_v15  ;;  %476 = vmatmul.f32.gmra.mxu0 %v356_v16 }
  0xd4   : > { %v451_v23 = vpop.f32.mrf.mxu3 }
  0xdc   : > { %v454_v33 = vpop.f32.mrf.mxu3 }
 0x132   : > { %v474_v27 = vpop.f32.mrf.mxu0 }
 0x138   : > { %v428_v24 = vpop.f32.mrf.mxu2 }
 0x139   : > { %v429_v28 = vadd.f32 %v883_v22, %v428_v24 }
 0x13a   : > { %v477_v35 = vpop.f32.mrf.mxu0 }
 0x13b   : > { %v452_v29 = vadd.f32 %v451_v23, %v429_v28 }
 0x13d   : > { %v475_v30 = vadd.f32 %v474_v27, %v452_v29 }
 0x13f   : > { %v480_v31 = vmax.f32 %v475_v30, 0.0 }
 0x140   : > { %v431_v32 = vpop.f32.mrf.mxu2 }
 0x141   : > { %v432_v34 = vadd.f32 %v883_v22, %v431_v32  ;;  %619 = vmatmul.f32.vlgmr.msrb.gmra.mxu3 %v480_v31 }
 0x143   : > { %v455_v36 = vadd.f32 %v454_v33, %v432_v34 }
 0x145   : > { %v478_v39 = vadd.f32 %v477_v35, %v455_v36 }
 0x147   : > { %v481_v40 = vmax.f32 %v478_v39, 0.0 }
 0x149   : > { %496 = vmatpush.msrb.mxu1 %v481_v40  ;;  %622 = vmatmul.f32.gmra.mxu3 %v481_v40 }
 0x14b   : > { %497 = vmatpush.msrb.mxu1 %v480_v31 }
 0x14c   : > { %784 = vmatmul.msk.f32.vlgmr.msrb.gmra.mxu1 %vm300_vm2, %v1208_v10  ;;  %v534_v10 = vld [vmem:[#allocation7 + $0x30] sm:$0xff] }
 0x14d   : > { %519 = vmatpush.msra.mxu1 %v481_v40  ;;  %589 = vmatpush.msrb.mxu2 %v534_v10 }
 0x14f   : > { %520 = vmatpush.msra.mxu1 %v480_v31  ;;  %590 = vmatpush.msrb.mxu2 %v533_v53 }
 0x151   : > { %795 = vmatpush.msrb.mxu1 %v575_v42  ;;  %591 = vmatpush.msrb.mxu2 %v532_v54 }
 0x153   : > { %796 = vmatpush.msrb.mxu1 %v574_v43  ;;  %592 = vmatpush.msrb.mxu2 %v531_v55 }
 0x154   : > { %785 = vmatmul.msk.f32.gmra.mxu1 %vm300_vm2, %v1219_v25  ;;  %v530_v25 = vld [vmem:[#allocation7 + $0x10] sm:$0xff] }
 0x155   : > { %797 = vmatpush.msrb.mxu1 %v573_v45  ;;  %593 = vmatpush.msrb.mxu2 %v530_v25 }
 0x157   : > { %798 = vmatpush.msrb.mxu1 %v572_v47  ;;  %594 = vmatpush.msrb.mxu2 %v529_v57 }
 0x159   : > { %799 = vmatpush.msrb.mxu1 %v571_v49  ;;  %595 = vmatpush.msrb.mxu2 %v528_v59 }
 0x15b   : > { %800 = vmatpush.msrb.mxu1 %v570_v56 }
 0x15c   : > { %786 = vmatmul.msk.f32.vlgmr.msra.gmra.mxu1 %vm300_vm2, %v1211_v11  ;;  %v567_v11 = vld [vmem:[#allocation7 + $0x138] sm:$0xff] }
 0x15d   : > { %801 = vmatpush.msrb.mxu1 %v569_v58  ;;  %634 = vmatpush.msra.mxu0 %v567_v11 }
 0x15f   : > { %802 = vmatpush.msrb.mxu1 %v568_v60  ;;  %635 = vmatpush.msra.mxu0 %v566_v61 }
 0x161   : > { %803 = vmatpush.msrb.mxu1 %v567_v11  ;;  %636 = vmatpush.msra.mxu0 %v565_v62 }
 0x163   : > { %804 = vmatpush.msrb.mxu1 %v566_v61 }
 0x164   : > { %787 = vmatmul.msk.f32.gmra.mxu1 %vm300_vm2, %v1221_v26  ;;  %v564_v26 = vld [vmem:[#allocation7 + $0x120] sm:$0xff] }
 0x165   : > { %805 = vmatpush.msrb.mxu1 %v565_v62  ;;  %637 = vmatpush.msra.mxu0 %v564_v26 }
 0x167   : > { %806 = vmatpush.msrb.mxu1 %v564_v26  ;;  %638 = vmatpush.msra.mxu0 %v563_v63 }
 0x169   : > { %807 = vmatpush.msrb.mxu1 %v563_v63  ;;  %639 = vmatpush.msra.mxu0 %v562_v0 }
 0x16b   : > { %808 = vmatpush.msrb.mxu1 %v562_v0  ;;  %640 = vmatpush.msra.mxu0 %v561_v1 }
 0x16d   : > { %809 = vmatpush.msrb.mxu1 %v561_v1  ;;  %641 = vmatpush.msra.mxu0 %v560_v2 }
 0x16f   : > { %810 = vmatpush.msrb.mxu1 %v560_v2 }
 0x1c4   : > { %v620_v14 = vpop.f32.mrf.mxu3 }
 0x1c9   : > { %v499_v3 = vpop.f32.mrf.mxu1 }
 0x1ca   : > { %596 = vmatmul.f32.vlgmr.msrb.gmra.mxu2 %v499_v3 }
 0x1cc   : > { %v623_v22 = vpop.f32.mrf.mxu3 }
 0x1d1   : > { %v502_v4 = vpop.f32.mrf.mxu1 }
 0x1d2   : > { %599 = vmatmul.f32.gmra.mxu2 %v502_v4 }
 0x1d9   : > { %v522_v7 = vpop.f32.mrf.mxu1 }
 0x1da   : > { %642 = vmatmul.f32.vlgmr.msra.gmra.mxu0 %v522_v7 }
 0x1e1   : > { %v525_v8 = vpop.f32.mrf.mxu1 }
 0x1e2   : > { %645 = vmatmul.f32.vlgmr.msrb.gmra.mxu1 %v525_v8 }
 0x24d   : > { %v597_v9 = vpop.f32.mrf.mxu2 }
 0x24e   : > { %v598_v13 = vadd.f32 %v884_v12, %v597_v9 }
 0x250   : > { %v621_v15 = vadd.f32 %v620_v14, %v598_v13 }
 0x255   : > { %v600_v16 = vpop.f32.mrf.mxu2 }
 0x256   : > { %v601_v19 = vadd.f32 %v884_v12, %v600_v16 }
 0x257   : > { %v643_v17 = vpop.f32.mrf.mxu0 }
 0x258   : > { %v644_v18 = vadd.f32 %v643_v17, %v621_v15  ;;  %v624_v23 = vadd.f32 %v623_v22, %v601_v19 }
 0x25a   : > { %v649_v20 = vadd.f32 %v644_v18, %v1205_v6 }
 0x25c   : > { %v651_v21 = vmax.f32 %v649_v20, 0.0 }
 0x25e   : > { %653 = vst [vmem:[%s277_s30] sm:$0xff] %v651_v21 }
 0x25f   : > { %v646_v24 = vpop.f32.mrf.mxu1 }
 0x260   : > { %v647_v27 = vadd.f32 %v646_v24, %v624_v23 }
 0x262   : > { %v650_v6 = vadd.f32 %v647_v27, %v1203_v5 }
 0x264   : > { %v652_v28 = vmax.f32 %v650_v6, 0.0 }
 0x266   : > { %654 = vst [vmem:[%s277_s30 + $0x8] sm:$0xff] %v652_v28 }
 0x267   : > { %1002 = shalt.err (!%p999_p10)
}
 0x268   : > { %s1052_s8 = smov 128   ;;  %s1053_s9 = smov 8  }
 0x269   : > { %821 = dma.vmem_to_hbm [thread:$0]  (%p1156_p3), %s669_s6, 256, %s671_s7, %s656_s22, %s1052_s8, %s1052_s8, %s1053_s9  }
 0x26a PF: > { %s685_s12 = sand.u32 1, %s1033_s18   ;;  %p1293_p12 = scmp.ge.s32.totalorder %s1045_s21, 2 }
 0x26b   : > { %s686_s13 = scalar_lea.sflag [#allocation4], %s685_s12 }
 0x26c   : > { %p835_p13 = pnand %p1293_p12, %p1119_p6 }
 0x26e   : > { %p836_p0 = pneg %p835_p13 }
 0x270   : > { %1028 = dma.done.wait (%p836_p0), %s686_s13, 256  }
 0x271   : > { %1030 = vsyncadd (%p836_p0), %s686_s13, 4294967040  ;;  %p19_p5 = scmp.ge.s32.totalorder %s1146_s14, 4   ;;  %s1294_s18 = smov %s1037_s19 }
 0x272   : > { %s1295_s19 = smov %s1041_s20  ;;  %s1296_s20 = smov %s1162_s23 }
 0x273   : > { %s1297_s21 = smov %s1146_s14  ;;  %21 = sbr.rel (!%p19_p5) target bundleno = 6 (0x6), region = 93 }
 0x278   :  { %692 = vsyncpa [#allocation3], 1 }
 0x279   :  { %694 = vsyncpa [#allocation3 + $0x1], 1 }
 0x27a   :  { %695 = vsyncpa [#allocation6], 1 }
 0x27b   :  { %696 = vsyncpa [#allocation4], 1 }
 0x27c   :  { %698 = vsyncpa [#allocation4 + $0x1], 1 }

</bundles_post_ra>
